<compile_context>
chip_gen: v7x
topology: tpu7x:2x2x1
jax: 0.10.0
libtpu: 0.0.40
codegen_flags: <defaults>
</compile_context>

<pallas_src>
import jax
import jax.numpy as jnp
from jax.experimental import pallas as pl
from jax.experimental.pallas import tpu as pltpu


NEG_SLOPE = 0.01  # nn.LeakyReLU() default negative_slope


def _leaky_relu(x):
    return jnp.where(x >= 0, x, NEG_SLOPE * x)


def _round_up(n, m):
    return ((n + m - 1) // m) * m


def _cdiv(a, b):
    return -(-a // b)


def _tpu_generation():
    """Best-effort TPU generation (5/6/7); 0 if unknown."""
    try:
        kind = jax.devices()[0].device_kind.lower()
    except Exception:
        return 0
    for g in (7, 6, 5, 4):
        if f"v{g}" in kind or f"tpu{g}" in kind:
            return g
    return 0


def _padded_tile_bytes(rows, cols, dtype):
    """VMEM footprint of a (rows, cols) block after (sublane, 128-lane) padding."""
    dt = jnp.dtype(dtype)
    sub = 8 * max(1, 4 // dt.itemsize)  # 8 for f32, 16 for bf16
    return _round_up(max(int(rows), 1), sub) * _round_up(max(int(cols), 1), 128) * dt.itemsize


def wdisc_kernel(x_ref, w1_ref, b1_ref, w2_ref, b2_ref, w3r_ref, b3_ref, y_ref):
    """Fused 3-layer MLP on one batch tile.

    MXU matmuls with f32 accumulation; bias adds + LeakyReLU in f32.  The final
    (H -> 1) projection is computed as (1, H) @ (tb, H)^T so the result is a
    lane-dense (1, tb) row (no narrow masked stores); the MXU is idle here so
    the M=1 matmul is free, and it avoids an explicit relayout/transpose.
    """
    x = x_ref[...].astype(w1_ref.dtype)  # per-tile cast (no extra HBM pass in the wrapper)

    h1 = jnp.dot(x, w1_ref[...], preferred_element_type=jnp.float32) + b1_ref[...]
    h1 = _leaky_relu(h1)

    h2 = jnp.dot(h1.astype(w2_ref.dtype), w2_ref[...],
                 preferred_element_type=jnp.float32) + b2_ref[...]
    h2 = _leaky_relu(h2)

    # (1, H) contracted with (tb, H) over H -> (1, tb): lane-dense output row.
    y_row = jax.lax.dot_general(
        w3r_ref[...], h2, (((1,), (1,)), ((), ())),
        preferred_element_type=jnp.float32) + b3_ref[...]
    y_ref[...] = y_row.astype(y_ref.dtype)


def wasserstein_discriminator_forward(x, params, *, block_b=None,
                                      compute_dtype=None,
                                      vmem_budget_bytes=None):
    """x: [B, in_feature]; params: dict of (w1, b1, w2, b2, w3, b3)."""
    w1, b1, w2, b2, w3, b3 = (params[k] for k in ("w1", "b1", "w2", "b2", "w3", "b3"))
    B, F = x.shape
    H = w1.shape[1]
    assert w1.shape == (F, H) and w2.shape == (H, H) and w3.shape == (H, 1)

    gen = _tpu_generation()
    two_cores = gen >= 7

    # bf16 MXU inputs by default on v6e/v7x; f32 elsewhere (v5e has no bf16 VPU
    # path and x DMA stays in its HBM dtype either way).
    if compute_dtype is None:
        compute_dtype = jnp.bfloat16 if gen >= 6 else jnp.float32
    cdt = jnp.dtype(compute_dtype)

    # VMEM budget / declared limit per generation (128 MiB physical on v5e/v6e,
    # 64 MiB on v7x; unknown -> conservative).
    if vmem_budget_bytes is None:
        vmem_budget_bytes = (80 << 20) if gen in (5, 6) else (32 << 20)
    vmem_cap = (100 << 20) if gen in (5, 6) else (48 << 20)
    if block_b is None:
        block_b = 4096 if gen in (5, 6) else 2048

    # Sublane alignment of the x tile in its HBM dtype.
    x_dt = jnp.dtype(x.dtype)
    align = 8 * max(1, 4 // x_dt.itemsize)

    tb = _round_up(min(int(block_b), _round_up(B, align)), align)
    # v7x: make sure the "parallel" batch axis has >= 2 tiles so both
    # TensorCores get work.  No-op on single-TC generations.
    if two_cores and B >= 2 * align:
        tb = min(tb, _round_up(_cdiv(B, 2), align))

    def vmem_estimate(tb_):
        est = 2 * _padded_tile_bytes(tb_, F, x_dt)            # double-buffered x tile
        est += 2 * _padded_tile_bytes(1, tb_, jnp.float32)    # double-buffered out row
        resident = (_padded_tile_bytes(F, H, cdt) + _padded_tile_bytes(H, H, cdt)
                    + 3 * _padded_tile_bytes(1, H, jnp.float32)
                    + _padded_tile_bytes(1, 1, jnp.float32))
        est += 2 * resident                                   # assume residents double-buffered
        est += 2 * _padded_tile_bytes(tb_, H, jnp.float32)    # h1/h2 f32 intermediates (spill)
        est += _padded_tile_bytes(tb_, F, cdt)                # in-kernel cast of x
        return est

    while tb > align and vmem_estimate(tb) > vmem_budget_bytes:
        tb = max(align, _round_up(tb // 2, align))

    num_tiles = _cdiv(B, tb)  # ragged last tile handled by Pallas; rows are independent

    # One-time small casts/reshapes of the weights (no pass over x).
    w1c = w1.astype(cdt)
    w2c = w2.astype(cdt)
    b1r = jnp.reshape(b1, (1, H)).astype(jnp.float32)
    b2r = jnp.reshape(b2, (1, H)).astype(jnp.float32)
    w3r = jnp.reshape(w3, (1, H)).astype(jnp.float32)
    b3r = jnp.reshape(b3, (1, 1)).astype(jnp.float32)

    vmem_limit = int(min(vmem_cap, max(32 << 20, int(1.5 * vmem_estimate(tb)))))

    def resident(shape):
        # Constant index_map -> stays VMEM-resident across grid steps.
        # TODO(synk): pipeline_mode=pl.Buffered(1) would drop the unused second
        # buffer of these residents; skipped (negligible bytes at these sizes).
        return pl.BlockSpec(shape, lambda i: (0,) * len(shape))

    y2d = pl.pallas_call(
        wdisc_kernel,
        out_shape=jax.ShapeDtypeStruct((num_tiles, tb), jnp.float32),
        grid_spec=pl.GridSpec(
            grid=(num_tiles,),
            in_specs=[
                pl.BlockSpec((tb, F), lambda i: (i, 0)),   # x: tiled over batch
                resident((F, H)), resident((1, H)),        # w1, b1
                resident((H, H)), resident((1, H)),        # w2, b2
                resident((1, H)), resident((1, 1)),        # w3 row, b3
            ],
            out_specs=pl.BlockSpec((1, tb), lambda i: (i, 0)),  # lane-dense rows
        ),
        compiler_params=pltpu.CompilerParams(
            dimension_semantics=("parallel",),  # shard batch tiles across TCs on v7x
            vmem_limit_bytes=vmem_limit,
        ),
    )(x, w1c, b1r, w2c, b2r, w3r, b3r)

    return y2d.reshape(num_tiles * tb, 1)[:B]


def init_params(key, in_feature, hidden_size):
    """Xavier-uniform weights + zero biases (matches the module's init_weight_)."""
    def xavier_uniform(k, fan_in, fan_out):
        limit = float(jnp.sqrt(6.0 / (fan_in + fan_out)))
        # Stored as [in, out] so the kernel computes x @ W.
        return jax.random.uniform(k, (fan_in, fan_out), jnp.float32, -limit, limit)

    k1, k2, k3 = jax.random.split(key, 3)
    return {
        "w1": xavier_uniform(k1, in_feature, hidden_size),
        "b1": jnp.zeros((hidden_size,), jnp.float32),
        "w2": xavier_uniform(k2, hidden_size, hidden_size),
        "b2": jnp.zeros((hidden_size,), jnp.float32),
        "w3": xavier_uniform(k3, hidden_size, 1),
        "b3": jnp.zeros((1,), jnp.float32),
    }


def reference_forward(x, p):
    h1 = _leaky_relu(x @ p["w1"] + p["b1"])
    h2 = _leaky_relu(h1 @ p["w2"] + p["b2"])
    return h2 @ p["w3"] + p["b3"]


if __name__ == "__main__":
    key = jax.random.PRNGKey(0)
    batch, in_feature, hidden_size = 8, 16, 32

    kx, kp, kb1, kb2, kb3, kx2 = jax.random.split(key, 6)
    x = jax.random.normal(kx, (batch, in_feature), jnp.float32)
    params = init_params(kp, in_feature, hidden_size)
    # Use non-zero biases so the bias-add path is actually exercised
    # (the module's own init uses zeros, which would hide bias bugs).
    params["b1"] = 0.1 * jax.random.normal(kb1, (hidden_size,), jnp.float32)
    params["b2"] = 0.1 * jax.random.normal(kb2, (hidden_size,), jnp.float32)
    params["b3"] = 0.1 * jax.random.normal(kb3, (1,), jnp.float32)

    y_ref = reference_forward(x, params)

    # 1) Explicit f32 MXU-input path (default-precision MXU on both sides,
    #    so tolerance is moderate rather than ulp-tight).
    y = wasserstein_discriminator_forward(x, params, compute_dtype=jnp.float32)
    y = jax.block_until_ready(y)
    assert y.shape == (batch, 1)
    assert jnp.allclose(y, y_ref, atol=2e-2, rtol=2e-2), "f32 mismatch vs reference"

    # 2) Auto dtype (bf16 MXU inputs on v6e/v7x, f32 accumulation), relaxed tol.
    y_auto = jax.block_until_ready(wasserstein_discriminator_forward(x, params))
    assert y_auto.shape == (batch, 1)
    assert jnp.allclose(y_auto, y_ref, atol=6e-2, rtol=6e-2), "auto-dtype mismatch vs reference"

    # 3) Multi-tile ragged batch: B not divisible by the tile -> cdiv grid,
    #    several grid steps, lane-dense (num_tiles, tb) output reshaped back.
    big_batch = 300
    x_big = jax.random.normal(kx2, (big_batch, in_feature), jnp.float32)
    y_big = wasserstein_discriminator_forward(x_big, params, block_b=128,
                                              compute_dtype=jnp.float32)
    y_big = jax.block_until_ready(y_big)
    y_big_ref = reference_forward(x_big, params)
    assert y_big.shape == (big_batch, 1)
    assert jnp.allclose(y_big, y_big_ref, atol=2e-2, rtol=2e-2), "tiled mismatch vs reference"

    print("KERNEL_OK")
</pallas_src>

<mosaic_0001>
module attributes {stable_mosaic.version = 11 : i64} {
  func.func @wdisc_kernel(%arg0: i32, %arg1: memref<8x16xf32, #tpu.memory_space<vmem>>, %arg2: memref<16x32xf32, #tpu.memory_space<vmem>>, %arg3: memref<1x32xf32, #tpu.memory_space<vmem>>, %arg4: memref<32x32xf32, #tpu.memory_space<vmem>>, %arg5: memref<1x32xf32, #tpu.memory_space<vmem>>, %arg6: memref<1x32xf32, #tpu.memory_space<vmem>>, %arg7: memref<1x1xf32, #tpu.memory_space<vmem>>, %arg8: memref<1x8xf32, #tpu.memory_space<vmem>>) attributes {dimension_semantics = [#tpu.dimension_semantics<parallel>], iteration_bounds = array<i64: 1>, scalar_prefetch = 0 : i64, scratch_operands = 0 : i64, tpu.core_type = #tpu.core_type<tc>, window_params = [{transform_indices = @transform_0, window_bounds = array<i64: 8, 16>}, {pipeline_mode = #tpu.pipeline_mode<synchronous>, transform_indices = @transform_1, window_bounds = array<i64: 16, 32>}, {pipeline_mode = #tpu.pipeline_mode<synchronous>, transform_indices = @transform_2, window_bounds = array<i64: 1, 32>}, {pipeline_mode = #tpu.pipeline_mode<synchronous>, transform_indices = @transform_3, window_bounds = array<i64: 32, 32>}, {pipeline_mode = #tpu.pipeline_mode<synchronous>, transform_indices = @transform_4, window_bounds = array<i64: 1, 32>}, {pipeline_mode = #tpu.pipeline_mode<synchronous>, transform_indices = @transform_5, window_bounds = array<i64: 1, 32>}, {pipeline_mode = #tpu.pipeline_mode<synchronous>, transform_indices = @transform_6, window_bounds = array<i64: 1, 1>}, {transform_indices = @transform_7, window_bounds = array<i64: 1, 8>}]} {
    %c0 = arith.constant 0 : index
    %c0_0 = arith.constant 0 : index
    %0 = vector.load %arg1[%c0, %c0_0] : memref<8x16xf32, #tpu.memory_space<vmem>>, vector<8x16xf32>
    %c0_1 = arith.constant 0 : index
    %c0_2 = arith.constant 0 : index
    %1 = vector.load %arg2[%c0_1, %c0_2] : memref<16x32xf32, #tpu.memory_space<vmem>>, vector<16x32xf32>
    %cst = arith.constant dense<0.000000e+00> : vector<8x32xf32>
    %2 = tpu.matmul %0, %1, %cst {dimension_numbers = #tpu.dot_dimension_numbers<[1], [0], [0], [1], [0, 0, 1, 1], [], []>} : vector<8x16xf32>, vector<16x32xf32>, vector<8x32xf32> -> vector<8x32xf32>
    %c0_3 = arith.constant 0 : index
    %c0_4 = arith.constant 0 : index
    %3 = vector.load %arg3[%c0_3, %c0_4] : memref<1x32xf32, #tpu.memory_space<vmem>>, vector<1x32xf32>
    %4 = vector.broadcast %3 : vector<1x32xf32> to vector<8x32xf32>
    %5 = arith.addf %2, %4 : vector<8x32xf32>
    %cst_5 = arith.constant 0.000000e+00 : f32
    %6 = vector.broadcast %cst_5 : f32 to vector<8x32xf32>
    %7 = arith.cmpf oge, %5, %6 : vector<8x32xf32>
    %cst_6 = arith.constant 0.00999999977 : f32
    %8 = vector.broadcast %cst_6 : f32 to vector<8x32xf32>
    %9 = arith.mulf %8, %5 : vector<8x32xf32>
    %10 = arith.select %7, %5, %9 : vector<8x32xi1>, vector<8x32xf32>
    %c0_7 = arith.constant 0 : index
    %c0_8 = arith.constant 0 : index
    %11 = vector.load %arg4[%c0_7, %c0_8] : memref<32x32xf32, #tpu.memory_space<vmem>>, vector<32x32xf32>
    %cst_9 = arith.constant dense<0.000000e+00> : vector<8x32xf32>
    %12 = tpu.matmul %10, %11, %cst_9 {dimension_numbers = #tpu.dot_dimension_numbers<[1], [0], [0], [1], [0, 0, 1, 1], [], []>} : vector<8x32xf32>, vector<32x32xf32>, vector<8x32xf32> -> vector<8x32xf32>
    %c0_10 = arith.constant 0 : index
    %c0_11 = arith.constant 0 : index
    %13 = vector.load %arg5[%c0_10, %c0_11] : memref<1x32xf32, #tpu.memory_space<vmem>>, vector<1x32xf32>
    %14 = vector.broadcast %13 : vector<1x32xf32> to vector<8x32xf32>
    %15 = arith.addf %12, %14 : vector<8x32xf32>
    %cst_12 = arith.constant 0.000000e+00 : f32
    %16 = vector.broadcast %cst_12 : f32 to vector<8x32xf32>
    %17 = arith.cmpf oge, %15, %16 : vector<8x32xf32>
    %cst_13 = arith.constant 0.00999999977 : f32
    %18 = vector.broadcast %cst_13 : f32 to vector<8x32xf32>
    %19 = arith.mulf %18, %15 : vector<8x32xf32>
    %20 = arith.select %17, %15, %19 : vector<8x32xi1>, vector<8x32xf32>
    %c0_14 = arith.constant 0 : index
    %c0_15 = arith.constant 0 : index
    %21 = vector.load %arg6[%c0_14, %c0_15] : memref<1x32xf32, #tpu.memory_space<vmem>>, vector<1x32xf32>
    %cst_16 = arith.constant dense<0.000000e+00> : vector<1x8xf32>
    %22 = tpu.matmul %21, %20, %cst_16 {dimension_numbers = #tpu.dot_dimension_numbers<[1], [1], [0], [0], [0, 0, 1, 0], [], []>} : vector<1x32xf32>, vector<8x32xf32>, vector<1x8xf32> -> vector<1x8xf32>
    %c0_17 = arith.constant 0 : index
    %c0_18 = arith.constant 0 : index
    %23 = vector.load %arg7[%c0_17, %c0_18] : memref<1x1xf32, #tpu.memory_space<vmem>>, vector<1x1xf32>
    %24 = vector.broadcast %23 : vector<1x1xf32> to vector<1x8xf32>
    %25 = arith.addf %22, %24 : vector<1x8xf32>
    %c0_19 = arith.constant 0 : index
    %c0_20 = arith.constant 0 : index
    %26 = vector.load %arg8[%c0_19, %c0_20] : memref<1x8xf32, #tpu.memory_space<vmem>>, vector<1x8xf32>
    tpu.vector_store %arg8[%c0_19, %c0_20], %25 {strides = array<i32>} : memref<1x8xf32, #tpu.memory_space<vmem>>, vector<1x8xf32>,
    return
  }
  func.func @transform_0(%arg0: i32) -> (i32, i32) {
    %c0_i32 = arith.constant 0 : i32
    %c0_i32_0 = arith.constant 0 : i32
    return %arg0, %c0_i32 : i32, i32
  }
  func.func @transform_1(%arg0: i32) -> (i32, i32) {
    %c0_i32 = arith.constant 0 : i32
    %c0_i32_0 = arith.constant 0 : i32
    %c0_i32_1 = arith.constant 0 : i32
    return %c0_i32, %c0_i32_0 : i32, i32
  }
  func.func @transform_2(%arg0: i32) -> (i32, i32) {
    %c0_i32 = arith.constant 0 : i32
    %c0_i32_0 = arith.constant 0 : i32
    %c0_i32_1 = arith.constant 0 : i32
    return %c0_i32, %c0_i32_0 : i32, i32
  }
  func.func @transform_3(%arg0: i32) -> (i32, i32) {
    %c0_i32 = arith.constant 0 : i32
    %c0_i32_0 = arith.constant 0 : i32
    %c0_i32_1 = arith.constant 0 : i32
    return %c0_i32, %c0_i32_0 : i32, i32
  }
  func.func @transform_4(%arg0: i32) -> (i32, i32) {
    %c0_i32 = arith.constant 0 : i32
    %c0_i32_0 = arith.constant 0 : i32
    %c0_i32_1 = arith.constant 0 : i32
    return %c0_i32, %c0_i32_0 : i32, i32
  }
  func.func @transform_5(%arg0: i32) -> (i32, i32) {
    %c0_i32 = arith.constant 0 : i32
    %c0_i32_0 = arith.constant 0 : i32
    %c0_i32_1 = arith.constant 0 : i32
    return %c0_i32, %c0_i32_0 : i32, i32
  }
  func.func @transform_6(%arg0: i32) -> (i32, i32) {
    %c0_i32 = arith.constant 0 : i32
    %c0_i32_0 = arith.constant 0 : i32
    %c0_i32_1 = arith.constant 0 : i32
    return %c0_i32, %c0_i32_0 : i32, i32
  }
  func.func @transform_7(%arg0: i32) -> (i32, i32) {
    %c0_i32 = arith.constant 0 : i32
    %c0_i32_0 = arith.constant 0 : i32
    return %arg0, %c0_i32 : i32, i32
  }
}

</mosaic_0001>

<bundles_post_ra>
// kernel: tpu_custom_call.1
= control target key start
LH: loop header
LB: loop body
LE: loop exit
PB: predicated region body
PF: predicated region fallthrough
CT: control target
= control target key end

     0   :  { %s623_s0 = inlined_call_operand.hbm [shape: f32[8,16], index: 0, kind: input, shape index: {}]   ;;  %s624_s1 = inlined_call_operand.hbm [shape: f32[16,32], index: 1, kind: input, shape index: {}]   ;;  %s625_s2 = inlined_call_operand.vmem [shape: f32[1,32], index: 2, kind: input, shape index: {}]   ;;  %s626_s3 = inlined_call_operand.hbm [shape: f32[32,32], index: 3, kind: input, shape index: {}]   ;;  %s627_s4 = inlined_call_operand.vmem [shape: f32[1,32], index: 4, kind: input, shape index: {}]   ;;  %s628_s5 = inlined_call_operand.vmem [shape: f32[1,32], index: 5, kind: input, shape index: {}]   ;;  %s629_s6 = inlined_call_operand.<no memory space> [shape: f32[1,1], index: 6, kind: input, shape index: {}]   ;;  %s630_s7 = inlined_call_operand.hbm [shape: f32[1,8], index: 7, kind: output, shape index: {}]  }
   0x1   :  { %v12_v0 = vstv %s629_s6 }
   0x2   :  { %13 = vst [vmem:[#allocation2] sm:$0x1] %v12_v0 }
   0x3   :  { %14 = vsyncpa [#allocation4], 0 }
   0x4   :  { %15 = vsyncpa [#allocation7], 0 }
   0x5   :  { %16 = vsyncpa [#allocation5], 0  ;;  %s501_s26 = smov [#allocation6]   ;;  %s407_s30 = scalar_lea.hbm %s624_s1, 256 }
   0x6   :  { %s32_s27 = sshll.u32 %s501_s26, 4  ;;  %p408_p0 = scmp.ne.s32.totalorder %s624_s1, %s407_s30  ;;  %s33_s27 = int_to_ptr.vmem [resolvable:$true] %s32_s27 }
   0x7   :  { %p411_p1 = scmp.lt.u32.totalorder %s407_s30, %s624_s1 }
   0x9   :  { %p413_p2 = pnand %p411_p1, %p408_p0 }
   0xb   :  { %416 = shalt.err (!%p413_p2)
}
   0xc   :  { %s417_s6 = scalar_lea.vmem %s33_s27, 256  ;;  %p422_p4 = scmp.lt.s32.totalorder %s33_s27, %s33_s27 }
   0xd   :  { %p418_p3 = scmp.ne.s32.totalorder %s33_s27, %s417_s6  ;;  %p423_p5 = scmp.lt.s32.totalorder %s417_s6, %s417_s6 }
   0xf   :  { %p424_p6 = por %p423_p5, %p422_p4 }
  0x11   :  { %p425_p7 = pnand %p424_p6, %p418_p3 }
  0x13   :  { %428 = shalt.err (!%p425_p7)
}
  0x14   :  { %s502_s12 = smov 128   ;;  %s503_s13 = smov 8  }
  0x15   :  { %38 = dma.hbm_to_vmem [thread:$0]  %s624_s1, 256, %s33_s27, [#allocation7], %s502_s12, %s502_s12, %s503_s13  }
  0x16   :  { %s504_s16 = smov [#allocation3]   ;;  %s505_s18 = smov [#allocation8]  }
  0x17   :  { %s23_s17 = sshll.u32 %s504_s16, 4  ;;  %s46_s19 = sshll.u32 %s505_s18, 4  ;;  %s24_s17 = int_to_ptr.vmem [resolvable:$true] %s23_s17  ;;  %s47_s19 = int_to_ptr.vmem [resolvable:$true] %s46_s19 }
  0x18   :  { %s429_s22 = scalar_lea.hbm %s623_s0, 128 }
  0x19   :  { %p430_p8 = scmp.ne.s32.totalorder %s623_s0, %s429_s22  ;;  %p433_p9 = scmp.lt.u32.totalorder %s429_s22, %s623_s0 }
  0x1b   :  { %p435_p10 = pnand %p433_p9, %p430_p8 }
  0x1d   :  { %438 = shalt.err (!%p435_p10)
}
  0x1e   :  { %s439_s1 = scalar_lea.vmem %s24_s17, 128  ;;  %p444_p12 = scmp.lt.s32.totalorder %s24_s17, %s24_s17 }
  0x1f   :  { %p440_p11 = scmp.ne.s32.totalorder %s24_s17, %s439_s1  ;;  %p445_p13 = scmp.lt.s32.totalorder %s439_s1, %s439_s1 }
  0x21   :  { %p446_p0 = por %p445_p13, %p444_p12 }
  0x23   :  { %p447_p1 = pnand %p446_p0, %p440_p11 }
  0x25   :  { %450 = shalt.err (!%p447_p1)
}
  0x26   :  { %26 = dma.hbm_to_vmem [thread:$0]  %s623_s0, 128, %s24_s17, [#allocation4]  }
  0x27   :  { %s451_s8 = scalar_lea.hbm %s626_s3, 512 }
  0x28   :  { %p452_p2 = scmp.ne.s32.totalorder %s626_s3, %s451_s8  ;;  %p455_p3 = scmp.lt.u32.totalorder %s451_s8, %s626_s3 }
  0x2a   :  { %p457_p4 = pnand %p455_p3, %p452_p2 }
  0x2c   :  { %460 = shalt.err (!%p457_p4)
}
  0x2d   :  { %s461_s14 = scalar_lea.vmem %s47_s19, 512  ;;  %p466_p6 = scmp.lt.s32.totalorder %s47_s19, %s47_s19 }
  0x2e   :  { %p462_p5 = scmp.ne.s32.totalorder %s47_s19, %s461_s14  ;;  %p467_p7 = scmp.lt.s32.totalorder %s461_s14, %s461_s14 }
  0x30   :  { %p468_p8 = por %p467_p7, %p466_p6 }
  0x32   :  { %p469_p9 = pnand %p468_p8, %p462_p5 }
  0x34   :  { %472 = shalt.err (!%p469_p9)
}
  0x35   :  { %52 = dma.hbm_to_vmem [thread:$0]  %s626_s3, 512, %s47_s19, [#allocation7], %s502_s12, %s502_s12, %s503_s13  }
  0x36   :  { %495 = dma.done.wait [#allocation4], 128  }
  0x37   :  { %496 = vsyncadd [#allocation4], 4294967168 }
  0x38   :  { %497 = dma.done.wait [#allocation7], 768  }
  0x39   :  { %498 = vsyncadd [#allocation7], 4294966528  ;;  %v506_v1 = vmov 0.0|0.0   ;;  %vm507_vm0 = vmmov 0   ;;  %v508_v2 = vmov 0.0   ;;  %v69_v3 = vld [vmem:[#allocation6] sm:$0xff]  ;;  %v250_v28 = vlaneseq }
  0x3a   :  { %387 = vmatprep.subr.bf16.mxu0 %v506_v1  ;;  %368 = vmatprep.mubr.msk.f32.mxu0 %vm507_vm0, %v508_v2  ;;  %v70_v4 = vld [vmem:[#allocation6 + $0x8] sm:$0xff]  ;;  %v155_v6 = vld [vmem:[#allocation8] sm:$0xff]  ;;  %v156_v7 = vld [vmem:[#allocation8 + $0x8] sm:$0xff]  ;;  %vm78_vm1 = vcmask 130048   ;;  %vm166_vm3 = vcmask 261120   ;;  %v509_v20 = vmov 0  }
  0x3b   :  { %390 = vmatprep.subr.bf16.mxu1 %v506_v1  ;;  %379 = vmatprep.mubr.msk.f32.mxu1 %vm507_vm0, %v508_v2  ;;  %v388_v5 = vpack.c.bf16 %v70_v4, %v69_v3  ;;  %v391_v8 = vpack.c.bf16 %v156_v7, %v155_v6  ;;  %v68_v9 = vld [vmem:[#allocation3] sm:$0xff]  ;;  %v157_v10 = vld [vmem:[#allocation8 + $0x10] sm:$0xff]  ;;  %v158_v11 = vld [vmem:[#allocation8 + $0x18] sm:$0xff]  ;;  %v251_v29 = vshrl.u32 %v250_v28, 7  ;;  %vm330_vm5 = vcmask 57344  }
  0x3c   :  { %v394_v12 = vpack.c.bf16 %v158_v11, %v157_v10  ;;  %v348_v13 = vld [vmem:[%s625_s2] ss:$0 sm:$0xff]  ;;  %406 = vset.pattern.permute.xlu0 %v509_v20 }
  0x3d   :  { %389 = vmatpush3.bf16.msra.mxu0 %v388_v5  ;;  %392 = vmatpush3.bf16.msra.mxu1 %v391_v8  ;;  %v244_v19 = vld [vmem:[#allocation2] sm:$0x1]  ;;  %v252_v30 = vsub.s32 0, %v251_v29 }
  0x3e   :  { %382 = vmatprep.subr.mxu0 %v508_v2  ;;  %393 = vmatprep.subr.bf16.mxu1 %v506_v1  ;;  %v350_v21 = vld [vmem:[%s627_s4] ss:$0 sm:$0xff]  ;;  %s510_s4 = smov [#allocation9]  }
  0x3f   :  { %247 = vperm.xlu0 %406, %v244_v19   ;;  %v243_v27 = vld [vmem:[%s628_s5] sm:$0x1]  ;;  %s338_s18 = sshll.u32 %s510_s4, 4  ;;  %s339_s18 = int_to_ptr.vmem [resolvable:$true] %s338_s18 }
  0x40   :  { %369 = vmatmul.mubr.msk.f32.vlgmr.msra.gmra.mrb[0].mxu0 %vm78_vm1, %v68_v9  ;;  %s473_s19 = scalar_lea.vmem %s339_s18, 16  ;;  %s477_s20 = scalar_lea.vmem %s339_s18, 32 }
  0x41   :  { %384 = vmatprep.mubr.msk.f32.mxu0 %vm507_vm0, %v508_v2  ;;  %395 = vmatpush3.bf16.msra.mxu1 %v394_v12  ;;  %p474_p10 = scmp.ne.s32.totalorder %s339_s18, %s473_s19  ;;  %p478_p11 = scmp.lt.s32.totalorder %s339_s18, %s339_s18 }
  0x42   :  { %p479_p12 = scmp.lt.s32.totalorder %s477_s20, %s473_s19 }
  0x44   :  { %p480_p13 = por %p479_p12, %p478_p11 }
  0x46   :  { %p481_p0 = pnand %p480_p13, %p474_p10 }
  0xbe   :  { %v248_v31 = vpop.permute.xlu0 %247 }
  0xbf   :  { %v253_v32 = vrot.slane %v248_v31, %v252_v30 }
 0x113   :  { %v148_v14 = vpop.f32.mrb[0].mxu0 }
 0x114   :  { %v149_v15 = vadd.f32 %v348_v13, %v148_v14  ;;  %v370_v16 = vpop.f32.mrb[1].mxu0 }
 0x116   :  { %vm152_vm2 = vcmp.ge.f32.partialorder %v149_v15, 0.0  ;;  %v153_v17 = vmul.f32 0.01, %v149_v15 }
 0x118   :  { %v154_v18 = vsel %vm152_vm2, %v149_v15, %v153_v17 }
 0x119   :  { %380 = vmatmul.mubr.msk.f32.vlgmr.msra.gmra.mrb[0].mxu1 %vm166_vm3, %v154_v18 }
 0x1ec   :  { %v236_v22 = vpop.f32.mrb[0].mxu1 }
 0x1ed   :  { %v237_v23 = vadd.f32 %v350_v21, %v236_v22  ;;  %v381_v24 = vpop.f32.mrb[1].mxu1 }
 0x1ef   :  { %vm240_vm4 = vcmp.ge.f32.partialorder %v237_v23, 0.0  ;;  %v241_v25 = vmul.f32 0.01, %v237_v23 }
 0x1f1   :  { %v242_v26 = vsel %vm240_vm4, %v237_v23, %v241_v25 }
 0x1f2   :  { %383 = vmatpush3.xpose.msk.msra.mxu0 %vm166_vm3, %v242_v26 }
 0x1f5   :  { %385 = vmatmul.mubr.msk.f32.vlgmr.msra.gmra.mrb[2].mxu0 %vm166_vm3, %v243_v27 }
 0x2c8   :  { %v326_v33 = vpop.f32.mrb[2].mxu0 }
 0x2c9   :  { %v327_v34 = vadd.f32 %v326_v33, %v253_v32  ;;  %v386_v35 = vpop.f32.mrb[3].mxu0 }
 0x2cb   :  { %331 = vst.msk [vmem:[#allocation9] sm:$0x1] %vm330_vm5, %v327_v34 }
 0x2cc   :  { %484 = shalt.err (!%p481_p0)
}
 0x2cd   :  { %s485_s22 = scalar_lea.hbm %s630_s7, 16 }
 0x2ce   :  { %p486_p1 = scmp.ne.s32.totalorder %s630_s7, %s485_s22  ;;  %p489_p2 = scmp.lt.u32.totalorder %s485_s22, %s630_s7 }
 0x2d0   :  { %p491_p3 = pnand %p489_p2, %p486_p1 }
 0x2d2   :  { %494 = shalt.err (!%p491_p3)
}
 0x2d3   :  { %341 = dma.vmem_to_hbm [thread:$0]  %s339_s18, 16, %s630_s7, [#allocation5]  }
 0x2d4   :  { %499 = dma.done.wait [#allocation5], 16  }
 0x2d5   :  { %500 = vsyncadd [#allocation5], 4294967280 }
 0x2d6   :  { %345 = vsyncpa [#allocation4], 1 }
 0x2d7   :  { %346 = vsyncpa [#allocation7], 1 }
 0x2d8   :  { %347 = vsyncpa [#allocation5], 1 }

</bundles_post_ra>
